<compile_context>
chip_gen: v5e
topology: v5e:2x2
jax: 0.10.0
libtpu: 0.0.40
codegen_flags: <defaults>
</compile_context>

<pallas_src>
import math
from functools import partial

import jax
import jax.numpy as jnp
from jax import lax
from jax.experimental import pallas as pl
from jax.experimental.pallas import tpu as pltpu

_VMEM_LIMIT = 32 * 1024 * 1024        # safe on v5e/v6e (128 MiB) and v7x (64 MiB)


def _round_up(x, m):
    return ((x + m - 1) // m) * m


# -----------------------------------------------------------------------------
# Kernel 1: tiled bf16 matmul + per-row bias (+ optional fused tanh fade-in)
# -----------------------------------------------------------------------------

def _matmul_bias_kernel(w_ref, x_ref, b_ref, o_ref, acc_ref):
    @pl.when(pl.program_id(2) == 0)
    def _init():
        acc_ref[...] = jnp.zeros_like(acc_ref)

    acc_ref[...] += jnp.dot(w_ref[...], x_ref[...],
                            preferred_element_type=jnp.float32)

    @pl.when(pl.program_id(2) == pl.num_programs(2) - 1)
    def _done():
        o_ref[...] = (acc_ref[...] + b_ref[...]).astype(o_ref.dtype)


def _matmul_bias_fade_kernel(alpha_ref, w_ref, x_ref, b_ref, up_ref, o_ref, acc_ref):
    @pl.when(pl.program_id(2) == 0)
    def _init():
        acc_ref[...] = jnp.zeros_like(acc_ref)

    acc_ref[...] += jnp.dot(w_ref[...], x_ref[...],
                            preferred_element_type=jnp.float32)

    @pl.when(pl.program_id(2) == pl.num_programs(2) - 1)
    def _done():
        a = alpha_ref[0]
        blend = a * (acc_ref[...] + b_ref[...]) + (1.0 - a) * up_ref[...]
        o_ref[...] = jnp.tanh(blend).astype(o_ref.dtype)


def _matmul_tiles(M, K, N):
    if M >= 256:
        tm = 256
    elif M >= 128:
        tm = 128
    else:
        tm = _round_up(M, 8)
    if K <= 1024:
        tk = K                                   # one K step, no K padding
    else:
        tk = next((c for c in (512, 384, 256, 128) if K % c == 0), 512)
    tn = min(512, _round_up(N, 128))
    Mp, Kp, Np = _round_up(M, tm), _round_up(K, tk), _round_up(N, tn)
    # Make sure at least one "parallel" axis has >= 2 tiles (v7x dual TC).
    if Mp // tm == 1 and Np // tn == 1 and tn >= 256:
        tn //= 2
        Np = _round_up(N, tn)
    return tm, tk, tn, Mp, Kp, Np


def matmul_bias(lhs, rhs, bias, *, out_dtype=jnp.bfloat16, fade_up=None, alpha=None):
    """lhs: (M, K), rhs: (K, N), bias: (M,) -> (M, N) in out_dtype.

    Lane-dense orientation (M = out channels, N = B*H*W), bf16 MXU operands,
    f32 VMEM accumulator, bias (+ optional tanh fade blend) in the last-K
    epilogue.  Output is bf16 by default to halve activation writeback.
    """
    M, K = lhs.shape
    N = rhs.shape[1]
    tm, tk, tn, Mp, Kp, Np = _matmul_tiles(M, K, N)

    lhs_p = jnp.pad(lhs.astype(jnp.bfloat16), ((0, Mp - M), (0, Kp - K)))
    rhs_p = jnp.pad(rhs.astype(jnp.bfloat16), ((0, Kp - K), (0, Np - N)))
    bias_p = jnp.pad(bias.astype(jnp.float32), (0, Mp - M)).reshape(Mp, 1)

    in_specs = [pl.BlockSpec((tm, tk), lambda i, j, k: (i, k)),
                pl.BlockSpec((tk, tn), lambda i, j, k: (k, j)),
                pl.BlockSpec((tm, 1), lambda i, j, k: (i, 0))]
    args = [lhs_p, rhs_p, bias_p]

    if fade_up is None:
        kern = _matmul_bias_kernel
    else:
        kern = _matmul_bias_fade_kernel
        up_p = jnp.pad(fade_up.astype(jnp.float32), ((0, Mp - M), (0, Np - N)))
        in_specs = ([pl.BlockSpec(memory_space=pltpu.MemorySpace.SMEM)] + in_specs +
                    [pl.BlockSpec((tm, tn), lambda i, j, k: (i, j))])
        args = [jnp.full((1,), alpha, jnp.float32)] + args + [up_p]

    out = pl.pallas_call(
        kern,
        out_shape=jax.ShapeDtypeStruct((Mp, Np), out_dtype),
        grid=(Mp // tm, Np // tn, Kp // tk),
        in_specs=in_specs,
        out_specs=pl.BlockSpec((tm, tn), lambda i, j, k: (i, j)),
        scratch_shapes=[pltpu.VMEM((tm, tn), jnp.float32)],
        compiler_params=pltpu.CompilerParams(
            dimension_semantics=("parallel", "parallel", "arbitrary"),
            vmem_limit_bytes=_VMEM_LIMIT),
    )(*args)
    return out[:M, :N]


# -----------------------------------------------------------------------------
# Kernel 2: fused [blur] -> +noise -> [leaky] -> InstanceNorm -> AdaIN
#   Layout: (C, B, H*W)  -- the whole spatial extent sits on the lane axis.
# -----------------------------------------------------------------------------

def _post_conv_kernel(nw_ref, x_ref, noise_ref, scale_ref, shift_ref, o_ref,
                      *scratch, do_blur, leaky, H, W):
    HW = H * W
    x = x_ref[...].astype(jnp.float32)                        # (tc, B, HW)

    if do_blur:
        # Separable [1,2,1]x[1,2,1]/16 blur on a zero-margined 1-D spatial
        # scratch.  Horizontal taps need column masks (row ends are adjacent
        # in the flattened axis); vertical taps fall into the zero margins at
        # the top/bottom rows, so no extra masks are needed there.
        pad_ref = scratch[0]
        P = W + 1
        tc, bb = pad_ref.shape[0], pad_ref.shape[1]
        zmargin = jnp.zeros((tc, bb, P), jnp.float32)
        pad_ref[:, :, 0:P] = zmargin
        pad_ref[:, :, P + HW:P + HW + P] = zmargin
        pad_ref[:, :, P:P + HW] = x

        col = lax.broadcasted_iota(jnp.int32, x.shape, 2) & (W - 1)  # W is pow2
        left = pad_ref[:, :, P - 1:P - 1 + HW]
        right = pad_ref[:, :, P + 1:P + 1 + HW]
        hb = (2.0 * x + jnp.where(col > 0, left, 0.0)
              + jnp.where(col < W - 1, right, 0.0))

        pad_ref[:, :, P:P + HW] = hb
        up = pad_ref[:, :, P - W:P - W + HW]
        dn = pad_ref[:, :, P + W:P + W + HW]
        x = (2.0 * hb + up + dn) * (1.0 / 16.0)

    x = x + nw_ref[0] * noise_ref[...]                        # NoiseInjection
    if leaky:
        x = jnp.where(x >= 0.0, x, 0.2 * x)                   # LeakyReLU(0.2)

    inv_n = 1.0 / float(HW)
    mean = jnp.sum(x, axis=2, keepdims=True) * inv_n
    d = x - mean
    var = jnp.sum(d * d, axis=2, keepdims=True) * inv_n
    xn = d * lax.rsqrt(var + 1e-5)                            # InstanceNorm
    o_ref[...] = (scale_ref[...] * xn + shift_ref[...]).astype(o_ref.dtype)


def post_conv(x, noise, noise_w, scale, shift, *, do_blur, leaky, H, W):
    """x: (C, B, H*W) bf16/f32; noise: (1, B, H*W); noise_w: (1,) SMEM scalar;
    scale/shift: (C, B, 1).  Returns bf16 (C, B, H*W)."""
    C, B, HW = x.shape
    assert HW == H * W and (W & (W - 1)) == 0, "W must be a power of two"
    pad_len = HW + 2 * (W + 1)

    # VMEM budget for the channel tile (double-buffered bf16 in/out + f32 blur
    # scratch + resident f32 noise).  Keep >=2 grid steps so both v7x cores
    # get work.
    fixed = B * HW * 4 * 2
    per_c = B * HW * (2 + 2) * 2
    if do_blur:
        per_c += B * pad_len * 4
    budget = 12 * 1024 * 1024
    tc = max(1, min(C, (budget - fixed) // max(per_c, 1)))
    if C >= 2:
        tc = min(tc, max(1, C // 2))
    while C % tc:
        tc -= 1

    kern = partial(_post_conv_kernel, do_blur=do_blur, leaky=leaky, H=H, W=W)
    scratch = [pltpu.VMEM((tc, B, pad_len), jnp.float32)] if do_blur else []
    return pl.pallas_call(
        kern,
        out_shape=jax.ShapeDtypeStruct((C, B, HW), jnp.bfloat16),
        grid=(C // tc,),
        in_specs=[
            pl.BlockSpec(memory_space=pltpu.MemorySpace.SMEM),          # noise weight
            pl.BlockSpec((tc, B, HW), lambda c: (c, 0, 0)),             # x
            pl.BlockSpec((1, B, HW), lambda c: (0, 0, 0)),              # noise
            pl.BlockSpec((tc, B, 1), lambda c: (c, 0, 0)),              # scale
            pl.BlockSpec((tc, B, 1), lambda c: (c, 0, 0)),              # shift
        ],
        out_specs=pl.BlockSpec((tc, B, HW), lambda c: (c, 0, 0)),
        scratch_shapes=scratch,
        compiler_params=pltpu.CompilerParams(
            dimension_semantics=("parallel",),
            vmem_limit_bytes=_VMEM_LIMIT),
    )(noise_w, x.astype(jnp.bfloat16), noise.astype(jnp.float32),
      scale.astype(jnp.float32), shift.astype(jnp.float32))


# -----------------------------------------------------------------------------
# Glue: convs (bf16 im2col in XLA, matmul in Pallas), upsampling, AdaIN prep
# -----------------------------------------------------------------------------

def conv2d(x, w, b, padding, *, out_dtype=jnp.bfloat16, fade_up=None, alpha=None):
    """x: (C, B, H, W); w: (OC, C, K, K) equalized-lr pre-scaled; b: (OC,)."""
    C, B, H, W = x.shape
    OC, _, K, _ = w.shape
    xb = x.astype(jnp.bfloat16)
    if padding:
        xb = jnp.pad(xb, ((0, 0), (0, 0), (padding, padding), (padding, padding)))
    Hp, Wp = H + 2 * padding, W + 2 * padding
    Ho, Wo = Hp - K + 1, Wp - K + 1
    if K == 1:
        cols = xb.reshape(C, B * Ho * Wo)
    else:
        # TODO(synk): im2col still materializes K*K shifted bf16 copies of the
        # activation in HBM; an in-kernel halo gather needs a (tc,H,W)->(tc,HW)
        # relayout per tap that Mosaic does not reliably support, so it stays
        # XLA-side for now.
        taps = [xb[:, :, r:r + Ho, c:c + Wo] for r in range(K) for c in range(K)]
        cols = jnp.stack(taps, axis=0).reshape(K * K * C, B * Ho * Wo)
    lhs = w.transpose(0, 2, 3, 1).reshape(OC, K * K * C)      # tap-major rows
    fu = None if fade_up is None else fade_up.reshape(OC, B * Ho * Wo)
    out = matmul_bias(lhs, cols, b, out_dtype=out_dtype, fade_up=fu, alpha=alpha)
    return out.reshape(OC, B, Ho, Wo)


def _subpixel_weight(w4):
    """w4: (IC, OC, 4, 4) conv_transpose(stride=2, pad=1) weight ->
    (4*OC, 9*IC) combined sub-pixel weight (tap-major columns) over a 3x3
    window of the 1-padded input; row block p = 2*pi + pj is output parity."""
    IC, OC = w4.shape[0], w4.shape[1]
    amap = {0: {0: 3, 1: 1}, 1: {1: 2, 2: 0}}   # parity -> {window tap: kernel tap}
    blocks = []
    for pi in range(2):
        for pj in range(2):
            g = jnp.zeros((OC, IC, 3, 3), w4.dtype)
            for r, ar in amap[pi].items():
                for c, ac in amap[pj].items():
                    g = g.at[:, :, r, c].set(w4[:, :, ar, ac].T)
            blocks.append(g.transpose(0, 2, 3, 1).reshape(OC, 9 * IC))
    return jnp.concatenate(blocks, axis=0)


def fused_upsample(x, w4, b):
    """conv_transpose2d(x, w4, stride=2, padding=1) via exact sub-pixel
    decomposition: one (4*OC, 9*IC) x (9*IC, B*H*W) matmul on the original
    (un-dilated) input, outputs interleaved into the 2x grid."""
    IC, B, H, W = x.shape
    OC = w4.shape[1]
    xp = jnp.pad(x.astype(jnp.bfloat16), ((0, 0), (0, 0), (1, 1), (1, 1)))
    taps = [xp[:, :, r:r + H, c:c + W] for r in range(3) for c in range(3)]
    cols = jnp.stack(taps, axis=0).reshape(9 * IC, B * H * W)
    y = matmul_bias(_subpixel_weight(w4), cols, jnp.tile(b, 4),
                    out_dtype=jnp.bfloat16)                     # (4*OC, B*H*W)
    # TODO(synk): this parity->pixel interleave is a full HBM shuffle in XLA
    # (now bf16, half the previous bytes); a direct strided scatter from the
    # matmul output is not expressible with block-aligned index_maps.
    y = y.reshape(2, 2, OC, B, H, W).transpose(2, 3, 4, 0, 5, 1)
    return y.reshape(OC, B, 2 * H, 2 * W)


def bilinear_up2(x):
    """F.interpolate(scale_factor=2, mode='bilinear', align_corners=False)."""
    x = x.astype(jnp.float32)
    C, B, H, W = x.shape

    def grid1d(n):
        i = jnp.arange(2 * n, dtype=jnp.float32)
        src = (i + 0.5) / 2.0 - 0.5
        i0 = jnp.floor(src)
        frac = src - i0
        lo = jnp.clip(i0, 0, n - 1).astype(jnp.int32)
        hi = jnp.clip(i0 + 1, 0, n - 1).astype(jnp.int32)
        return lo, hi, frac

    r0, r1, rf = grid1d(H)
    c0, c1, cf = grid1d(W)
    x00 = x[:, :, r0, :][:, :, :, c0]
    x01 = x[:, :, r0, :][:, :, :, c1]
    x10 = x[:, :, r1, :][:, :, :, c0]
    x11 = x[:, :, r1, :][:, :, :, c1]
    cfb = cf[None, None, None, :]
    rfb = rf[None, None, :, None]
    top = x00 * (1.0 - cfb) + x01 * cfb
    bot = x10 * (1.0 - cfb) + x11 * cfb
    return top * (1.0 - rfb) + bot * rfb


def adain_with_noise(x, noise, p, w, *, leaky, do_blur):
    """[blur] -> NoiseInjection -> [LeakyReLU] -> InstanceNorm -> AdaIN.
    Style affines are tiny (B,D)@(D,C) -> plain XLA dots (no kernel launch)."""
    C, B, H, W = x.shape
    scale = (w @ p['ss_w'] + p['ss_b']).T.reshape(C, B, 1)
    shift = (w @ p['sb_w'] + p['sb_b']).T.reshape(C, B, 1)
    out = post_conv(x.reshape(C, B, H * W), noise.reshape(1, B, H * W), p['nw'],
                    scale, shift, do_blur=do_blur, leaky=leaky, H=H, W=W)
    return out.reshape(C, B, H, W)


# -----------------------------------------------------------------------------
# Parameters (deterministic synthetic init)
# -----------------------------------------------------------------------------

def init_params(key, dlatents_dim, in_channels, img_channels, resolution,
                fmap_base, fmap_decay, fmap_max):
    def nf(stage):
        return min(int(fmap_base / 2.0 ** (stage * fmap_decay)), fmap_max)

    res_log2 = int(math.log2(resolution))
    assert resolution == 2 ** res_log2 and resolution >= 4

    keys = iter(jax.random.split(key, 256))

    def nrm(shape):
        return jax.random.normal(next(keys), shape, jnp.float32)

    def ws_conv(ic, oc, k):
        scale = math.sqrt(2.0 / (ic * k * k))
        return {'w': nrm((oc, ic, k, k)) * scale, 'b': nrm((oc,)) * 0.1}

    def adain(c):
        lscale = math.sqrt(2.0 / dlatents_dim)
        return {
            'nw': jnp.full((1,), 0.1, jnp.float32),               # NoiseInjection weight
            'ss_w': (nrm((c, dlatents_dim)) * lscale).T,          # (D, C)
            'ss_b': jnp.ones((1, c), jnp.float32),
            'sb_w': (nrm((c, dlatents_dim)) * lscale).T,
            'sb_b': jnp.zeros((1, c), jnp.float32),
        }

    def fused_up(ic, oc, k=3):
        mult = math.sqrt(2.0 / (ic * k * k))
        w = nrm((ic, oc, k, k)) * mult
        wp = jnp.pad(w, ((0, 0), (0, 0), (1, 1), (1, 1)))
        w4 = (wp[:, :, 1:, 1:] + wp[:, :, :-1, 1:] +
              wp[:, :, 1:, :-1] + wp[:, :, :-1, :-1]) / 4.0       # (IC, OC, 4, 4)
        return {'w': w4, 'b': nrm((oc,)) * 0.1}

    params = {
        'initial': {
            'const': jnp.ones((1, in_channels, 4, 4), jnp.float32),
            'adain1': adain(in_channels),
            'conv': ws_conv(in_channels, in_channels, 3),
            'adain2': adain(in_channels),
        },
        'to_rgb': [ws_conv(in_channels, img_channels, 1)],
        'blocks': [],
    }
    for res in range(2, res_log2):
        ic, oc = nf(res - 1), nf(res)
        fused = ic <= 256
        blk = {'fused': fused,
               'up': fused_up(ic, oc, 3) if fused else ws_conv(ic, oc, 3),
               'adain1': adain(oc),
               'conv2': ws_conv(oc, oc, 3),
               'adain2': adain(oc)}
        params['blocks'].append(blk)
        params['to_rgb'].append(ws_conv(oc, img_channels, 1))
    return params


# -----------------------------------------------------------------------------
# Forward pass (internal activation layout: (C, B, H, W), bf16 between kernels)
# -----------------------------------------------------------------------------

def gsynthesis_block(blk, x, w_pair, key):
    k1, k2 = jax.random.split(key)
    if blk['fused']:
        x = fused_upsample(x, blk['up']['w'], blk['up']['b'])
    else:
        x = jnp.repeat(jnp.repeat(x, 2, axis=2), 2, axis=3)      # nearest x2
        x = conv2d(x, blk['up']['w'], blk['up']['b'], padding=1)
    C, B, H, W = x.shape
    n1 = jax.random.normal(k1, (1, B, H, W), jnp.float32)
    x = adain_with_noise(x, n1, blk['adain1'], w_pair[:, 0], leaky=True, do_blur=True)
    x = conv2d(x, blk['conv2']['w'], blk['conv2']['b'], padding=1)
    n2 = jax.random.normal(k2, (1, B, H, W), jnp.float32)
    x = adain_with_noise(x, n2, blk['adain2'], w_pair[:, 1], leaky=True, do_blur=False)
    return x


def gsynthesis_forward(params, dlatents, alpha, steps, noise_key):
    B = dlatents.shape[0]
    ini = params['initial']
    C0 = ini['const'].shape[1]
    keys = list(jax.random.split(noise_key, 2 + len(params['blocks'])))
    ki = iter(keys)

    # ---- InputBlock (4x4); PyTorch applies noise1 to the batch-1 constant,
    # so that noise map is shared across the batch. No LeakyReLU here.
    x = jnp.broadcast_to(ini['const'].reshape(C0, 1, 4, 4), (C0, B, 4, 4))
    n1 = jnp.broadcast_to(jax.random.normal(next(ki), (1, 1, 4, 4), jnp.float32),
                          (1, B, 4, 4))
    x = adain_with_noise(x, n1, ini['adain1'], dlatents[:, 0], leaky=False, do_blur=False)
    x = conv2d(x, ini['conv']['w'], ini['conv']['b'], padding=1)
    n2 = jax.random.normal(next(ki), (1, B, 4, 4), jnp.float32)
    x = adain_with_noise(x, n2, ini['adain2'], dlatents[:, 1], leaky=False, do_blur=False)

    rgb = params['to_rgb']
    if steps == 0:
        out = conv2d(x, rgb[0]['w'], rgb[0]['b'], padding=0, out_dtype=jnp.float32)
        return out.transpose(1, 0, 2, 3)

    for idx in range(steps - 1):
        x = gsynthesis_block(params['blocks'][idx], x,
                             dlatents[:, 2 * (idx + 1):2 * (idx + 2)], next(ki))

    up = bilinear_up2(x)
    final_upscaled = conv2d(up, rgb[steps - 1]['w'], rgb[steps - 1]['b'], padding=0,
                            out_dtype=jnp.float32)
    x = gsynthesis_block(params['blocks'][steps - 1], x,
                         dlatents[:, 2 * steps:2 * (steps + 1)], next(ki))
    # Final to_rgb with the tanh fade-in fused into the matmul epilogue.
    out = conv2d(x, rgb[steps]['w'], rgb[steps]['b'], padding=0,
                 out_dtype=jnp.float32, fade_up=final_upscaled, alpha=alpha)
    return out.transpose(1, 0, 2, 3)                              # -> NCHW


# -----------------------------------------------------------------------------

if __name__ == "__main__":
    key = jax.random.PRNGKey(0)
    pkey, dkey, nkey = jax.random.split(key, 3)

    # Small test configuration (resolution 16 -> two progressive blocks).
    dlatents_dim = 32
    params = init_params(pkey, dlatents_dim=dlatents_dim, in_channels=16,
                         img_channels=3, resolution=16,
                         fmap_base=64, fmap_decay=1.0, fmap_max=16)

    B = 2
    steps = 2                      # generate at 16x16 with fade-in
    alpha = 0.7
    num_layers = 2 * (steps + 1)
    dlatents = jax.random.normal(dkey, (B, num_layers, dlatents_dim), jnp.float32)

    out = gsynthesis_forward(params, dlatents, alpha, steps, nkey)
    jax.block_until_ready(out)
    assert out.shape == (B, 3, 16, 16), out.shape
    assert bool(jnp.all(jnp.isfinite(out)))
    print("KERNEL_OK")
</pallas_src>

<mosaic_0001>
module attributes {stable_mosaic.version = 11 : i64} {
  func.func @_post_conv_kernel(%arg0: i32, %arg1: memref<1xf32, #tpu.memory_space<smem>>, %arg2: memref<8x2x16xbf16, #tpu.memory_space<vmem>>, %arg3: memref<1x2x16xf32, #tpu.memory_space<vmem>>, %arg4: memref<8x2x1xf32, #tpu.memory_space<vmem>>, %arg5: memref<8x2x1xf32, #tpu.memory_space<vmem>>, %arg6: memref<8x2x16xbf16, #tpu.memory_space<vmem>>) attributes {dimension_semantics = [#tpu.dimension_semantics<parallel>], iteration_bounds = array<i64: 2>, scalar_prefetch = 0 : i64, scratch_operands = 0 : i64, tpu.core_type = #tpu.core_type<tc>, window_params = [{transform_indices = @transform_0, window_bounds = array<i64: 1>}, {transform_indices = @transform_1, window_bounds = array<i64: 8, 2, 16>}, {pipeline_mode = #tpu.pipeline_mode<synchronous>, transform_indices = @transform_2, window_bounds = array<i64: 1, 2, 16>}, {transform_indices = @transform_3, window_bounds = array<i64: 8, 2, 1>}, {transform_indices = @transform_4, window_bounds = array<i64: 8, 2, 1>}, {transform_indices = @transform_5, window_bounds = array<i64: 8, 2, 16>}]} {
    %c0 = arith.constant 0 : index
    %c0_0 = arith.constant 0 : index
    %c0_1 = arith.constant 0 : index
    %0 = vector.load %arg2[%c0, %c0_0, %c0_1] : memref<8x2x16xbf16, #tpu.memory_space<vmem>>, vector<8x2x16xbf16>
    %1 = arith.extf %0 : vector<8x2x16xbf16> to vector<8x2x16xf32>
    %c0_2 = arith.constant 0 : index
    %2 = memref.load %arg1[%c0_2] : memref<1xf32, #tpu.memory_space<smem>>
    %c0_3 = arith.constant 0 : index
    %c0_4 = arith.constant 0 : index
    %c0_5 = arith.constant 0 : index
    %3 = vector.load %arg3[%c0_3, %c0_4, %c0_5] : memref<1x2x16xf32, #tpu.memory_space<vmem>>, vector<1x2x16xf32>
    %4 = vector.broadcast %2 : f32 to vector<1x2x16xf32>
    %5 = arith.mulf %4, %3 : vector<1x2x16xf32>
    %6 = vector.broadcast %5 : vector<1x2x16xf32> to vector<8x2x16xf32>
    %7 = arith.addf %1, %6 : vector<8x2x16xf32>
    %cst = arith.constant dense<0.000000e+00> : vector<8x2xf32>
    %8 = vector.multi_reduction <add>, %7, %cst [2] : vector<8x2x16xf32> to vector<8x2xf32>
    %9 = vector.shape_cast %8 : vector<8x2xf32> to vector<8x2x1xf32>
    %cst_6 = arith.constant 6.250000e-02 : f32
    %10 = vector.broadcast %cst_6 : f32 to vector<8x2x1xf32>
    %11 = arith.mulf %9, %10 : vector<8x2x1xf32>
    %12 = vector.broadcast %11 : vector<8x2x1xf32> to vector<8x2x16xf32>
    %13 = arith.subf %7, %12 : vector<8x2x16xf32>
    %14 = arith.mulf %13, %13 : vector<8x2x16xf32>
    %cst_7 = arith.constant dense<0.000000e+00> : vector<8x2xf32>
    %15 = vector.multi_reduction <add>, %14, %cst_7 [2] : vector<8x2x16xf32> to vector<8x2xf32>
    %16 = vector.shape_cast %15 : vector<8x2xf32> to vector<8x2x1xf32>
    %cst_8 = arith.constant 6.250000e-02 : f32
    %17 = vector.broadcast %cst_8 : f32 to vector<8x2x1xf32>
    %18 = arith.mulf %16, %17 : vector<8x2x1xf32>
    %cst_9 = arith.constant 9.99999974E-6 : f32
    %19 = vector.broadcast %cst_9 : f32 to vector<8x2x1xf32>
    %20 = arith.addf %18, %19 : vector<8x2x1xf32>
    %21 = math.rsqrt %20 : vector<8x2x1xf32>
    %22 = vector.broadcast %21 : vector<8x2x1xf32> to vector<8x2x16xf32>
    %23 = arith.mulf %13, %22 : vector<8x2x16xf32>
    %c0_10 = arith.constant 0 : index
    %c0_11 = arith.constant 0 : index
    %c0_12 = arith.constant 0 : index
    %24 = vector.load %arg4[%c0_10, %c0_11, %c0_12] : memref<8x2x1xf32, #tpu.memory_space<vmem>>, vector<8x2x1xf32>
    %25 = vector.broadcast %24 : vector<8x2x1xf32> to vector<8x2x16xf32>
    %26 = arith.mulf %25, %23 : vector<8x2x16xf32>
    %c0_13 = arith.constant 0 : index
    %c0_14 = arith.constant 0 : index
    %c0_15 = arith.constant 0 : index
    %27 = vector.load %arg5[%c0_13, %c0_14, %c0_15] : memref<8x2x1xf32, #tpu.memory_space<vmem>>, vector<8x2x1xf32>
    %28 = vector.broadcast %27 : vector<8x2x1xf32> to vector<8x2x16xf32>
    %29 = arith.addf %26, %28 : vector<8x2x16xf32>
    %30 = arith.truncf %29 : vector<8x2x16xf32> to vector<8x2x16xbf16>
    %c0_16 = arith.constant 0 : index
    %c0_17 = arith.constant 0 : index
    %c0_18 = arith.constant 0 : index
    %31 = vector.load %arg6[%c0_16, %c0_17, %c0_18] : memref<8x2x16xbf16, #tpu.memory_space<vmem>>, vector<8x2x16xbf16>
    tpu.vector_store %arg6[%c0_16, %c0_17, %c0_18], %30 {strides = array<i32>} : memref<8x2x16xbf16, #tpu.memory_space<vmem>>, vector<8x2x16xbf16>,
    return
  }
  func.func @transform_0(%arg0: i32) -> i32 {
    %c0_i32 = arith.constant 0 : i32
    %c0_i32_0 = arith.constant 0 : i32
    return %c0_i32 : i32
  }
  func.func @transform_1(%arg0: i32) -> (i32, i32, i32) {
    %c0_i32 = arith.constant 0 : i32
    %c0_i32_0 = arith.constant 0 : i32
    %c0_i32_1 = arith.constant 0 : i32
    return %arg0, %c0_i32, %c0_i32_0 : i32, i32, i32
  }
  func.func @transform_2(%arg0: i32) -> (i32, i32, i32) {
    %c0_i32 = arith.constant 0 : i32
    %c0_i32_0 = arith.constant 0 : i32
    %c0_i32_1 = arith.constant 0 : i32
    %c0_i32_2 = arith.constant 0 : i32
    return %c0_i32, %c0_i32_0, %c0_i32_1 : i32, i32, i32
  }
  func.func @transform_3(%arg0: i32) -> (i32, i32, i32) {
    %c0_i32 = arith.constant 0 : i32
    %c0_i32_0 = arith.constant 0 : i32
    %c0_i32_1 = arith.constant 0 : i32
    return %arg0, %c0_i32, %c0_i32_0 : i32, i32, i32
  }
  func.func @transform_4(%arg0: i32) -> (i32, i32, i32) {
    %c0_i32 = arith.constant 0 : i32
    %c0_i32_0 = arith.constant 0 : i32
    %c0_i32_1 = arith.constant 0 : i32
    return %arg0, %c0_i32, %c0_i32_0 : i32, i32, i32
  }
  func.func @transform_5(%arg0: i32) -> (i32, i32, i32) {
    %c0_i32 = arith.constant 0 : i32
    %c0_i32_0 = arith.constant 0 : i32
    %c0_i32_1 = arith.constant 0 : i32
    return %arg0, %c0_i32, %c0_i32_0 : i32, i32, i32
  }
}

</mosaic_0001>

<bundles_post_ra>
// kernel: tpu_custom_call.1
= control target key start
LH: loop header
LB: loop body
LE: loop exit
PB: predicated region body
PF: predicated region fallthrough
CT: control target
= control target key end

     0   :  { %s1184_s0 = inlined_call_operand.<no memory space> [shape: f32[1], index: 0, kind: input, shape index: {}]   ;;  %s1185_s1 = inlined_call_operand.vmem [shape: bf16[16,2,16], index: 1, kind: input, shape index: {}]   ;;  %s1186_s2 = inlined_call_operand.vmem [shape: f32[1,2,16], index: 2, kind: input, shape index: {}]   ;;  %s1187_s3 = inlined_call_operand.vmem [shape: f32[16,2,1], index: 3, kind: input, shape index: {}]   ;;  %s1188_s4 = inlined_call_operand.vmem [shape: f32[16,2,1], index: 4, kind: input, shape index: {}]   ;;  %s1189_s5 = inlined_call_operand.hbm [shape: bf16[16,2,16], index: 5, kind: output, shape index: {}]  }
   0x1   :  { %10 = sst [smem:[#allocation2]] %s1184_s0 }
   0x2   :  { %11 = vsyncpa [#allocation4], 0 }
   0x3   :  { %13 = vsyncpa [#allocation4 + $0x1], 0  ;;  %s875_s20 = smov 0   ;;  %s877_s21 = smov 0  }
   0x4   :  { %s879_s22 = smov 0   ;;  %s881_s23 = smov 0  }
   0x5 LB: > { %s699_s0 = sadd.s32 4294967295, %s837_s23   ;;  %s700_s24 = sadd.s32 4294967294, %s837_s23   ;;  %s837_s23 = sphi %s881_s23, %s1197_s23   ;;  %s833_s22 = sphi %s879_s22, %s1196_s22   ;;  %s829_s21 = sphi %s877_s21, %s1195_s21   ;;  %s825_s20 = sphi %s875_s20, %s1194_s20  }
   0x6   : > { %s898_s25 = sadd.s32 1, %s837_s23   ;;  %s146_s26 = sadd.s32 1, %s833_s22 }
   0x7   : > { %s143_s27 = ssub.s32 %s837_s23, %s898_s25  ;;  %p156_p0 = scmp.ne.s32.totalorder %s833_s22, %s829_s21 }
   0x8   : > { %p144_p1 = scmp.eq.s32.totalorder %s143_s27, 0  ;;  %p157_p2 = scmp.eq.s32.totalorder %s699_s0, 1 }
   0x9   : > { %p162_p3 = scmp.ne.s32.totalorder %s829_s21, %s825_s20  ;;  %p163_p4 = scmp.eq.s32.totalorder %s700_s24, 1 }
   0xa   : > { %s908_s28 = scalar_select %p144_p1, %s833_s22, %s146_s26  }
   0xb   : > { %p910_p5 = por %p157_p2, %p156_p0  ;;  %p914_p6 = por %p163_p4, %p162_p3 }
   0xc   : > { %p703_p7 = scmp.ge.s32.totalorder %s837_s23, 1  ;;  %p213_p8 = scmp.lt.s32.totalorder %s837_s23, 3 }
   0xe   : > { %p214_p9 = pnand %p703_p7, %p213_p8 }
   0xf   : > { %s920_s6 = sshll.u32 (!%p214_p9), %s699_s0, 3  ;;  %s284_s7 = sld [smem:[#allocation2]] (!%p214_p9) }
  0x10   : > { %217 = sbr.rel (%p214_p9) target bundleno = 328 (0x148), region = 40  ;;  %p251_p10 = scmp.lt.s32.totalorder (!%p214_p9), %s920_s6, 15 }
  0x11   : > { %s247_s24 = sand.u32 (!%p214_p9), 1, %s829_s21   ;;  %s613_s9 = scalar_lea.hbm (!%p214_p9), %s1189_s5, %s920_s6 }
  0x12   : > { %s704_s26 = sshll.u32 (!%p214_p9), %s247_s24, 3  ;;  %s1144_s10 = sshll.u32 (!%p214_p9), %s613_s9, 4  ;;  %s617_s10 = int_to_ptr.hbm [resolvable:$true] %s1144_s10 }
  0x13   : > { %s1104_s27 = scalar_lea.vmem (!%p214_p9), [#allocation3], %s704_s26  ;;  %s603_s11 = scalar_lea.sflag (!%p214_p9), [#allocation4], %s247_s24 }
  0x14   : > { %s789_s12 = sshra.s32 (!%p214_p9), %s617_s10, 4  ;;  %s795_s16 = scalar_lea.hbm (!%p214_p9), %s1189_s5, 16  ;;  %s790_s12 = int_to_ptr.hbm [resolvable:$true] %s789_s12 }
  0x15   : > { %v839_v0 = vmov 0   ;;  %s924_s8 = scalar_select %p251_p10, %s920_s6, 15  ;;  %v285_v1 = vld [vmem:[%s1186_s2] sm:$0x3]  ;;  %v286_v3 = vstv %s284_s7  ;;  %vm296_vm0 = vcmask 123904   ;;  %vm593_vm4 = vcmask 122880  }
  0x16   : > { %757 = vset.pattern.permute.xlu2 %v839_v0  ;;  %756 = vset.pattern.permute.xlu1 %v839_v0  ;;  %v287_v7 = vmul.f32 %v286_v3, %v285_v1  ;;  %s614_s6 = sshll.u32 %s1104_s27, 4  ;;  %p796_p0 = scmp.lt.s32.totalorder %s790_s12, %s1189_s5  ;;  %s615_s6 = int_to_ptr.vmem [resolvable:$true] %s614_s6 }
  0x17   : > { %758 = vset.pattern.permute.xlu0 %v839_v0  ;;  %s253_s13 = scalar_lea.vmem %s1185_s1, %s924_s8  ;;  %s707_s14 = sshll.u32 %s924_s8, 1 }
  0x18   : > { %v272_v2 = vld [vmem:[%s253_s13 + $0x4] sm:$0x1]  ;;  %v270_v4 = vld [vmem:[%s253_s13 + $0x2] sm:$0x1]  ;;  %v268_v5 = vld [vmem:[%s253_s13] sm:$0x1]  ;;  %s259_s17 = scalar_lea.vmem %s1187_s3, %s707_s14  ;;  %s972_s0 = scalar_lea.vmem %s1188_s4, %s707_s14 }
  0x19   : > { %v280_v6 = vunpack.c.l.bf16 %v272_v2  ;;  %v278_v8 = vunpack.c.l.bf16 %v270_v4  ;;  %v276_v9 = vunpack.c.l.bf16 %v268_v5  ;;  %v273_v10 = vld [vmem:[%s253_s13 + $0x5] sm:$0x1]  ;;  %v271_v11 = vld [vmem:[%s253_s13 + $0x3] sm:$0x1]  ;;  %v269_v12 = vld [vmem:[%s253_s13 + $0x1] sm:$0x1] }
  0x1a   : > { %v281_v13 = vunpack.c.l.bf16 %v273_v10  ;;  %v279_v17 = vunpack.c.l.bf16 %v271_v11  ;;  %v277_v18 = vunpack.c.l.bf16 %v269_v12  ;;  %v275_v25 = vld [vmem:[%s253_s13 + $0x7] sm:$0x1]  ;;  %v274_v26 = vld [vmem:[%s253_s13 + $0x6] sm:$0x1]  ;;  %v474_v36 = vld [vmem:[%s259_s17 + $0x2] sm:$0x3] }
  0x1b   : > { %v933_v14 = vadd.f32 %v287_v7, %v280_v6  ;;  %v935_v15 = vadd.f32 %v287_v7, %v278_v8  ;;  %v937_v16 = vadd.f32 %v287_v7, %v276_v9  ;;  %v283_v29 = vunpack.c.l.bf16 %v275_v25  ;;  %v475_v37 = vld [vmem:[%s259_s17 + $0x4] sm:$0x3]  ;;  %v476_v38 = vld [vmem:[%s259_s17 + $0x6] sm:$0x3]  ;;  %v473_v39 = vld [vmem:[%s259_s17] sm:$0x3] }
  0x1c   : > { %v945_v22 = vadd.f32 %v287_v7, %v281_v13  ;;  %v947_v23 = vadd.f32 %v287_v7, %v279_v17  ;;  %v949_v24 = vadd.f32 %v287_v7, %v277_v18  ;;  %v282_v31 = vunpack.c.l.bf16 %v274_v26  ;;  %v530_v40 = vld [vmem:[%s972_s0 + $0x2] sm:$0x3]  ;;  %v478_v41 = vld [vmem:[%s259_s17 + $0xa] sm:$0x3]  ;;  %v477_v42 = vld [vmem:[%s259_s17 + $0x8] sm:$0x3] }
  0x1d   : > { %v309_v19 = vsel %vm296_vm0, %v933_v14, 0.0  ;;  %v303_v20 = vsel %vm296_vm0, %v935_v15, 0.0  ;;  %v297_v21 = vsel %vm296_vm0, %v937_v16, 0.0  ;;  %v957_v32 = vadd.f32 %v287_v7, %v283_v29  ;;  %v533_v43 = vld [vmem:[%s972_s0 + $0x8] sm:$0x3]  ;;  %s791_s13 = scalar_lea.hbm %s790_s12, 8 }
  0x1e   : > { %310 = vadd.xlane.f32.xlu2 %v309_v19  ;;  %304 = vadd.xlane.f32.xlu1 %v303_v20  ;;  %v312_v27 = vsel %vm296_vm0, %v945_v22, 0.0  ;;  %v306_v28 = vsel %vm296_vm0, %v947_v23, 0.0  ;;  %v300_v30 = vsel %vm296_vm0, %v949_v24, 0.0  ;;  %v959_v33 = vadd.f32 %v287_v7, %v282_v31  ;;  %v480_v44 = vld [vmem:[%s259_s17 + $0xe] sm:$0x3]  ;;  %p792_p11 = scmp.ne.s32.totalorder %s790_s12, %s791_s13  ;;  %p797_p1 = scmp.lt.s32.totalorder %s795_s16, %s791_s13 }
  0x1f   : > { %298 = vadd.xlane.f32.xlu0 %v297_v21  ;;  %v318_v34 = vsel %vm296_vm0, %v957_v32, 0.0  ;;  %v479_v45 = vld [vmem:[%s259_s17 + $0xc] sm:$0x3]  ;;  %v531_v46 = vld [vmem:[%s972_s0 + $0x4] sm:$0x3] }
  0x20   : > { %v315_v35 = vsel %vm296_vm0, %v959_v33, 0.0  ;;  %v529_v47 = vld [vmem:[%s972_s0] sm:$0x3]  ;;  %v532_v48 = vld [vmem:[%s972_s0 + $0x6] sm:$0x3]  ;;  %p793_p12 = pnand %p792_p11, %p910_p5  ;;  %p798_p2 = por %p797_p1, %p796_p0 }
  0x21   : > { %v535_v25 = vld [vmem:[%s972_s0 + $0xc] sm:$0x3]  ;;  %v534_v26 = vld [vmem:[%s972_s0 + $0xa] sm:$0x3] }
  0x22   : > { %p794_p13 = pneg %p793_p12 }
  0x24   : > { %p799_p3 = pnand %p798_p2, %p794_p13 }
  0x26   : > { %313 = vadd.xlane.f32.xlu2 %v312_v27  ;;  %307 = vadd.xlane.f32.xlu1 %v306_v28  ;;  %v536_v27 = vld [vmem:[%s972_s0 + $0xe] sm:$0x3] }
  0x27   : > { %301 = vadd.xlane.f32.xlu0 %v300_v30 }
  0x2e   : > { %319 = vadd.xlane.f32.xlu1 %v318_v34 }
  0x2f   : > { %316 = vadd.xlane.f32.xlu0 %v315_v35 }
  0x3e   : > { %488 = vperm.xlu2 %757, %v474_v36  }
  0x43   : > { %493 = vperm.xlu0 %758, %v475_v37  }
  0x46   : > { %498 = vperm.xlu2 %757, %v476_v38  }
  0x47   : > { %483 = vperm.xlu1 %756, %v473_v39  }
  0x4b   : > { %544 = vperm.xlu0 %758, %v530_v40  }
  0x4e   : > { %508 = vperm.xlu2 %757, %v478_v41  }
  0x4f   : > { %503 = vperm.xlu1 %756, %v477_v42  }
  0x53   : > { %559 = vperm.xlu0 %758, %v533_v43  }
  0x56   : > { %518 = vperm.xlu2 %757, %v480_v44  }
  0x57   : > { %513 = vperm.xlu1 %756, %v479_v45  }
  0x5e   : > { %549 = vperm.xlu2 %757, %v531_v46  }
  0x5f   : > { %539 = vperm.xlu1 %756, %v529_v47  }
  0x67   : > { %554 = vperm.xlu1 %756, %v532_v48  }
  0x91   : > { %v311_v49 = vpop.xlane.xlu2 %310  ;;  %v305_v50 = vpop.xlane.xlu1 %304 }
  0x92   : > { %v323_v51 = vmul.f32 0.0625, %v305_v50  ;;  %v299_v52 = vpop.xlane.xlu0 %298  ;;  %v325_v1 = vmul.f32 0.0625, %v311_v49 }
  0x93   : > { %v321_v53 = vmul.f32 0.0625, %v299_v52 }
  0x94   : > { %v980_v54 = vsub.f32 %v935_v15, %v323_v51  ;;  %v1005_v8 = vsub.f32 %v933_v14, %v325_v1 }
  0x95   : > { %v983_v55 = vsub.f32 %v937_v16, %v321_v53 }
  0x96   : > { %v339_v56 = vmul.f32 %v980_v54, %v980_v54  ;;  %v341_v14 = vmul.f32 %v1005_v8, %v1005_v8 }
  0x97   : > { %v337_v57 = vmul.f32 %v983_v55, %v983_v55 }
  0x98   : > { %v351_v58 = vsel %vm296_vm0, %v339_v56, 0.0  ;;  %v357_v20 = vsel %vm296_vm0, %v341_v14, 0.0 }
  0x99   : > { %v314_v59 = vpop.xlane.xlu2 %313  ;;  %352 = vadd.xlane.f32.xlu1 %v351_v58  ;;  %v308_v60 = vpop.xlane.xlu1 %307  ;;  %v345_v61 = vsel %vm296_vm0, %v337_v57, 0.0 }
  0x9a   : > { %v326_v62 = vmul.f32 0.0625, %v314_v59  ;;  %v324_v63 = vmul.f32 0.0625, %v308_v60  ;;  %346 = vadd.xlane.f32.xlu2 %v345_v61  ;;  %v302_v0 = vpop.xlane.xlu0 %301 }
  0x9b   : > { %v322_v2 = vmul.f32 0.0625, %v302_v0 }
  0x9c   : > { %v992_v3 = vsub.f32 %v945_v22, %v326_v62  ;;  %v995_v4 = vsub.f32 %v947_v23, %v324_v63 }
  0x9d   : > { %v998_v5 = vsub.f32 %v949_v24, %v322_v2 }
  0x9e   : > { %v342_v6 = vmul.f32 %v992_v3, %v992_v3  ;;  %v340_v7 = vmul.f32 %v995_v4, %v995_v4 }
  0x9f   : > { %v338_v9 = vmul.f32 %v998_v5, %v998_v5 }
  0xa0   : > { %v360_v10 = vsel %vm296_vm0, %v342_v6, 0.0  ;;  %v354_v11 = vsel %vm296_vm0, %v340_v7, 0.0 }
  0xa1   : > { %361 = vadd.xlane.f32.xlu1 %v360_v10  ;;  %v348_v12 = vsel %vm296_vm0, %v338_v9, 0.0  ;;  %v320_v13 = vpop.xlane.xlu1 %319  ;;  %v1032_v29 = vpop.permute.xlu2 %488 }
  0xa2   : > { %355 = vadd.xlane.f32.xlu2 %v354_v11  ;;  %349 = vadd.xlane.f32.xlu0 %v348_v12  ;;  %v317_v15 = vpop.xlane.xlu0 %316  ;;  %v328_v17 = vmul.f32 0.0625, %v320_v13 }
  0xa3   : > { %v327_v16 = vmul.f32 0.0625, %v317_v15 }
  0xa4   : > { %v1018_v19 = vsub.f32 %v957_v32, %v328_v17 }
  0xa5   : > { %v1015_v18 = vsub.f32 %v959_v33, %v327_v16 }
  0xa6   : > { %v344_v23 = vmul.f32 %v1018_v19, %v1018_v19 }
  0xa7   : > { %v343_v21 = vmul.f32 %v1015_v18, %v1015_v18 }
  0xa8   : > { %v366_v24 = vsel %vm296_vm0, %v344_v23, 0.0 }
  0xa9   : > { %v363_v22 = vsel %vm296_vm0, %v343_v21, 0.0  ;;  %v1036_v31 = vpop.permute.xlu2 %498 }
  0xaa   : > { %358 = vadd.xlane.f32.xlu0 %v357_v20  ;;  %364 = vadd.xlane.f32.xlu2 %v363_v22 }
  0xb1   : > { %v1040_v33 = vpop.permute.xlu2 %508 }
  0xb2   : > { %367 = vadd.xlane.f32.xlu0 %v366_v24 }
  0xb5   : > { %v1042_v34 = vpop.permute.xlu0 %493 }
  0xb9   : > { %v1030_v28 = vpop.permute.xlu1 %483  ;;  %v1046_v36 = vpop.permute.xlu2 %518 }
  0xba   : > { %569 = vperm.xlu1 %756, %v535_v25  }
  0xbd   : > { %v1048_v37 = vpop.permute.xlu0 %544 }
  0xc1   : > { %v1034_v30 = vpop.permute.xlu1 %503  ;;  %v1052_v39 = vpop.permute.xlu2 %549 }
  0xc2   : > { %564 = vperm.xlu2 %757, %v534_v26  }
  0xc5   : > { %v1054_v41 = vpop.permute.xlu0 %559 }
  0xc6   : > { %574 = vperm.xlu0 %758, %v536_v27  }
  0xc9   : > { %v1038_v32 = vpop.permute.xlu1 %513 }
  0xd1   : > { %v1044_v35 = vpop.permute.xlu1 %539 }
  0xd9   : > { %v1050_v38 = vpop.permute.xlu1 %554 }
 0x10c   : > { %v353_v40 = vpop.xlane.xlu1 %352 }
 0x10d   : > { %v371_v42 = vmul.f32 0.0625, %v353_v40  ;;  %v347_v43 = vpop.xlane.xlu2 %346 }
 0x10e   : > { %v369_v44 = vmul.f32 0.0625, %v347_v43 }
 0x10f   : > { %v379_v45 = vadd.f32 1e-05, %v371_v42 }
 0x110   : > { %v377_v46 = vadd.f32 1e-05, %v369_v44 }
 0x111   : > { %759 = vrsqrt.f32 %v379_v45  ;;  %vm411_vm1 = vweird.f32 %v379_v45 }
 0x112   : > { %761 = vrsqrt.f32 %v377_v46  ;;  %vm391_vm6 = vweird.f32 %v377_v46 }
 0x114   : > { %v362_v47 = vpop.xlane.xlu1 %361 }
 0x115   : > { %v374_v48 = vmul.f32 0.0625, %v362_v47  ;;  %v356_v49 = vpop.xlane.xlu2 %355  ;;  %v350_v50 = vpop.xlane.xlu0 %349 }
 0x116   : > { %v372_v51 = vmul.f32 0.0625, %v356_v49  ;;  %v370_v52 = vmul.f32 0.0625, %v350_v50 }
 0x117   : > { %v760_v53 = vpop.eup %759  ;;  %v1056_v56 = vadd.f32 1e-05, %v374_v48 }
 0x118   : > { %v762_v57 = vpop.eup %761  ;;  %v406_v58 = vmul.f32 %v760_v53, %v379_v45  ;;  %v1058_v59 = vadd.f32 1e-05, %v372_v51  ;;  %v1060_v60 = vadd.f32 1e-05, %v370_v52  ;;  %vm412_vm2 = vweird.f32 %v760_v53 }
 0x119   : > { %v386_v61 = vmul.f32 %v762_v57, %v377_v46  ;;  %763 = vrsqrt.f32 %v1056_v56  ;;  %vm392_vm3 = vweird.f32 %v762_v57  ;;  %vm413_vm5 = vmor %vm411_vm1, %vm412_vm2  ;;  %vm441_vm8 = vweird.f32 %v1056_v56 }
 0x11a   : > { %v407_v62 = vmul.f32 %v760_v53, %v406_v58  ;;  %765 = vrsqrt.f32 %v1058_v59  ;;  %vm393_vm7 = vmor %vm391_vm6, %vm392_vm3  ;;  %vm421_vm9 = vweird.f32 %v1058_v59  ;;  %vm401_vm15 = vweird.f32 %v1060_v60 }
 0x11b   : > { %v387_v63 = vmul.f32 %v762_v57, %v386_v61  ;;  %767 = vrsqrt.f32 %v1060_v60 }
 0x11c   : > { %v408_v0 = vmul.f32 0.5, %v407_v62 }
 0x11d   : > { %v388_v1 = vmul.f32 0.5, %v387_v63  ;;  %v365_v2 = vpop.xlane.xlu2 %364  ;;  %v359_v6 = vpop.xlane.xlu0 %358 }
 0x11e   : > { %v409_v7 = vsub.f32 1.5, %v408_v0  ;;  %v375_v9 = vmul.f32 0.0625, %v365_v2  ;;  %v373_v10 = vmul.f32 0.0625, %v359_v6 }
 0x11f   : > { %v1065_v11 = vpop.eup %763  ;;  %v389_v12 = vsub.f32 1.5, %v388_v1 }
 0x120   : > { %v766_v13 = vpop.eup %765  ;;  %v410_v15 = vmul.f32 %v760_v53, %v409_v7  ;;  %v436_v16 = vmul.f32 %v1065_v11, %v1056_v56  ;;  %v1069_v17 = vadd.f32 1e-05, %v375_v9  ;;  %v1073_v22 = vadd.f32 1e-05, %v373_v10 }
 0x121   : > { %v768_v14 = vpop.eup %767  ;;  %v390_v20 = vmul.f32 %v762_v57, %v389_v12  ;;  %v416_v21 = vmul.f32 %v766_v13, %v1058_v59  ;;  %vm442_vm10 = vweird.f32 %v1065_v11  ;;  %vm422_vm11 = vweird.f32 %v766_v13 }
 0x122   : > { %v414_v23 = vsel %vm413_vm5, %v760_v53, %v410_v15  ;;  %v437_v24 = vmul.f32 %v1065_v11, %v436_v16  ;;  %v396_v25 = vmul.f32 %v768_v14, %v1060_v60  ;;  %769 = vrsqrt.f32 %v1069_v17  ;;  %vm1093_vm13 = vmor %vm441_vm8, %vm442_vm10 }
 0x123   : > { %v467_v26 = vmul.f32 %v414_v23, %v980_v54  ;;  %v394_v27 = vsel %vm393_vm7, %v762_v57, %v390_v20  ;;  %v417_v40 = vmul.f32 %v766_v13, %v416_v21  ;;  %771 = vrsqrt.f32 %v1073_v22  ;;  %vm423_vm14 = vmor %vm421_vm9, %vm422_vm11 }
 0x124   : > { %v465_v42 = vmul.f32 %v394_v27, %v983_v55  ;;  %v438_v43 = vmul.f32 0.5, %v437_v24  ;;  %v397_v44 = vmul.f32 %v768_v14, %v396_v25  ;;  %vm402_vm12 = vweird.f32 %v768_v14 }
 0x125   : > { %v523_v45 = vmul.f32 %v1042_v34, %v467_v26  ;;  %v418_v46 = vmul.f32 0.5, %v417_v40  ;;  %v368_v54 = vpop.xlane.xlu0 %367  ;;  %vm403_vm0 = vmor %vm401_vm15, %vm402_vm12  ;;  %v565_v20 = vpop.permute.xlu2 %564  ;;  %vm451_vm1 = vweird.f32 %v1069_v17  ;;  %vm431_vm6 = vweird.f32 %v1073_v22 }
 0x126   : > { %v521_v47 = vmul.f32 %v1030_v28, %v465_v42  ;;  %v439_v48 = vsub.f32 1.5, %v438_v43  ;;  %v398_v49 = vmul.f32 0.5, %v397_v44  ;;  %v376_v50 = vmul.f32 0.0625, %v368_v54 }
 0x127   : > { %v579_v55 = vadd.f32 %v1052_v39, %v523_v45  ;;  %v419_v51 = vsub.f32 1.5, %v418_v46 }
 0x128   : > { %v577_v52 = vadd.f32 %v1044_v35, %v521_v47  ;;  %v399_v53 = vsub.f32 1.5, %v398_v49  ;;  %v440_v57 = vmul.f32 %v1065_v11, %v439_v48  ;;  %v1098_v28 = vadd.f32 1e-05, %v376_v50  ;;  %v770_v58 = vpop.eup %769 }
 0x129   : > { %v587_v61 = vpack.c.bf16 %v579_v55, %v579_v55  ;;  %v420_v62 = vmul.f32 %v766_v13, %v419_v51  ;;  %v446_v35 = vmul.f32 %v770_v58, %v1069_v17  ;;  %v772_v56 = vpop.eup %771  ;;  %vm452_vm2 = vweird.f32 %v770_v58 }
 0x12a   : > { %v585_v39 = vpack.c.bf16 %v577_v52, %v577_v52  ;;  %v400_v63 = vmul.f32 %v768_v14, %v399_v53  ;;  %v444_v59 = vsel %vm1093_vm13, %v1065_v11, %v440_v57  ;;  %773 = vrsqrt.f32 %v1098_v28  ;;  %vm453_vm5 = vmor %vm451_vm1, %vm452_vm2 }
 0x12b   : > { %596 = vst.msk [vmem:[%s1104_s27 + $0x2] sm:$0x1] %vm593_vm4, %v587_v61  ;;  %v424_v0 = vsel %vm423_vm14, %v766_v13, %v420_v62  ;;  %v447_v2 = vmul.f32 %v770_v58, %v446_v35  ;;  %v426_v6 = vmul.f32 %v772_v56, %v1073_v22  ;;  %v470_v9 = vmul.f32 %v444_v59, %v992_v3 }
 0x12c   : > { %594 = vst.msk [vmem:[%s1104_s27] sm:$0x1] %vm593_vm4, %v585_v39  ;;  %v468_v60 = vmul.f32 %v424_v0, %v995_v4  ;;  %v404_v1 = vsel %vm403_vm0, %v768_v14, %v400_v63  ;;  %vm432_vm3 = vweird.f32 %v772_v56  ;;  %v570_v45 = vpop.permute.xlu1 %569  ;;  %vm461_vm9 = vweird.f32 %v1098_v28 }
 0x12d   : > { %v466_v7 = vmul.f32 %v404_v1, %v998_v5  ;;  %v448_v12 = vmul.f32 0.5, %v447_v2  ;;  %v427_v13 = vmul.f32 %v772_v56, %v426_v6  ;;  %v526_v15 = vmul.f32 %v1040_v33, %v470_v9  ;;  %vm433_vm7 = vmor %vm431_vm6, %vm432_vm3 }
 0x12e   : > { %v524_v10 = vmul.f32 %v1036_v31, %v468_v60 }
 0x12f   : > { %v522_v11 = vmul.f32 %v1032_v29, %v466_v7  ;;  %v449_v4 = vsub.f32 1.5, %v448_v12  ;;  %v428_v14 = vmul.f32 0.5, %v427_v13  ;;  %v582_v3 = vadd.f32 %v565_v20, %v526_v15 }
 0x130   : > { %v580_v16 = vadd.f32 %v1050_v38, %v524_v10  ;;  %v774_v21 = vpop.eup %773 }
 0x131   : > { %v578_v23 = vadd.f32 %v1048_v37, %v522_v11  ;;  %v429_v31 = vsub.f32 1.5, %v428_v14  ;;  %v456_v29 = vmul.f32 %v774_v21, %v1098_v28  ;;  %v590_v38 = vpack.c.bf16 %v582_v3, %v582_v3 }
 0x132   : > { %v588_v5 = vpack.c.bf16 %v580_v16, %v580_v16  ;;  %v450_v24 = vmul.f32 %v770_v58, %v449_v4  ;;  %vm462_vm8 = vweird.f32 %v774_v21 }
 0x133   : > { %v586_v33 = vpack.c.bf16 %v578_v23, %v578_v23  ;;  %v430_v25 = vmul.f32 %v772_v56, %v429_v31  ;;  %v457_v37 = vmul.f32 %v774_v21, %v456_v29  ;;  %599 = vst.msk [vmem:[%s1104_s27 + $0x5] sm:$0x1] %vm593_vm4, %v590_v38  ;;  %vm463_vm10 = vmor %vm461_vm9, %vm462_vm8 }
 0x134   : > { %597 = vst.msk [vmem:[%s1104_s27 + $0x3] sm:$0x1] %vm593_vm4, %v588_v5  ;;  %v454_v17 = vsel %vm453_vm5, %v770_v58, %v450_v24 }
 0x135   : > { %595 = vst.msk [vmem:[%s1104_s27 + $0x1] sm:$0x1] %vm593_vm4, %v586_v33  ;;  %v434_v26 = vsel %vm433_vm7, %v772_v56, %v430_v25  ;;  %v458_v27 = vmul.f32 0.5, %v457_v37  ;;  %v471_v40 = vmul.f32 %v454_v17, %v1015_v18 }
 0x136   : > { %v469_v42 = vmul.f32 %v434_v26, %v1005_v8 }
 0x137   : > { %v459_v43 = vsub.f32 1.5, %v458_v27  ;;  %v527_v22 = vmul.f32 %v1038_v32, %v471_v40 }
 0x138   : > { %v525_v44 = vmul.f32 %v1034_v30, %v469_v42  ;;  %v575_v49 = vpop.permute.xlu0 %574 }
 0x139   : > { %v583_v46 = vadd.f32 %v570_v45, %v527_v22  ;;  %v460_v54 = vmul.f32 %v774_v21, %v459_v43 }
 0x13a   : > { %v581_v8 = vadd.f32 %v1054_v41, %v525_v44 }
 0x13b   : > { %v591_v18 = vpack.c.bf16 %v583_v46, %v583_v46  ;;  %v464_v47 = vsel %vm463_vm10, %v774_v21, %v460_v54 }
 0x13c   : > { %v589_v32 = vpack.c.bf16 %v581_v8, %v581_v8  ;;  %v472_v30 = vmul.f32 %v464_v47, %v1018_v19 }
 0x13d   : > { %600 = vst.msk [vmem:[%s1104_s27 + $0x6] sm:$0x1] %vm593_vm4, %v591_v18 }
 0x13e   : > { %598 = vst.msk [vmem:[%s1104_s27 + $0x4] sm:$0x1] %vm593_vm4, %v589_v32  ;;  %v528_v48 = vmul.f32 %v1046_v36, %v472_v30 }
 0x140   : > { %v584_v41 = vadd.f32 %v575_v49, %v528_v48 }
 0x142   : > { %v592_v50 = vpack.c.bf16 %v584_v41, %v584_v41 }
 0x144   : > { %601 = vst.msk [vmem:[%s1104_s27 + $0x7] sm:$0x1] %vm593_vm4, %v592_v50 }
 0x145   : > { %802 = shalt.err (!%p799_p3)
}
 0x146   : > { %s840_s19 = smov 16   ;;  %s841_s0 = smov 1  }
 0x147   : > { %714 = dma.vmem_to_hbm [thread:$0]  (%p910_p5), %s615_s6, 128, %s617_s10, %s603_s11, %s840_s19, %s840_s19, %s841_s0  }
 0x148 PF: > { %p720_p4 = scmp.ge.s32.totalorder %s837_s23, 2  ;;  %s631_s24 = sand.u32 1, %s825_s20  }
 0x149   : > { %s632_s26 = scalar_lea.sflag [#allocation4], %s631_s24 }
 0x14a   : > { %p717_p7 = pnand %p720_p4, %p914_p6 }
 0x14c   : > { %p718_p8 = pneg %p717_p7 }
 0x14e   : > { %820 = dma.done.wait (%p718_p8), %s632_s26, 128  }
 0x14f   : > { %822 = vsyncadd (%p718_p8), %s632_s26, 4294967168  ;;  %p16_p9 = scmp.ge.s32.totalorder %s898_s25, 4   ;;  %s1194_s20 = smov %s829_s21 }
 0x150   : > { %s1195_s21 = smov %s833_s22  ;;  %s1196_s22 = smov %s908_s28 }
 0x151   : > { %s1197_s23 = smov %s898_s25  ;;  %18 = sbr.rel (!%p16_p9) target bundleno = 5 (0x5), region = 81 }
 0x156   :  { %638 = vsyncpa [#allocation4], 1 }
 0x157   :  { %640 = vsyncpa [#allocation4 + $0x1], 1 }

</bundles_post_ra>
